<compile_context>
chip_gen: v5e
topology: v5e:2x2
jax: 0.10.0
libtpu: 0.0.40
codegen_flags: <defaults>
</compile_context>

<pallas_src>
import functools

import numpy as np
import jax
import jax.numpy as jnp
from jax.experimental import pallas as pl
from jax.experimental.pallas import tpu as pltpu


def _round_up(n, m):
    return ((n + m - 1) // m) * m


def _vmem_capacity_bytes():
    cap = 64 << 20  # conservative fallback (v7x per-TC capacity)
    try:
        info = pltpu.get_tpu_info()
        cap = int(getattr(info, "vmem_capacity_bytes", cap))
    except Exception:
        pass
    return cap


def _scoped_vmem_bytes(cap):
    """Explicit scoped-VMEM limit with ~25% headroom for the compiler."""
    return min(int(cap * 0.75), 100 << 20)


# ---------------------------------------------------------------------------
# Kernels
# ---------------------------------------------------------------------------

def _swiff_step(x_ref, w13_ref, w2_ref, acc_ref):
    """acc += (silu(x@W1_blk) * (x@W3_blk)) @ W2_blk   for one hidden tile."""
    th = w2_ref.shape[0]
    # Single fused up-projection on the MXU (W1|W3 interleaved), f32 accumulate.
    h13 = jnp.dot(x_ref[...], w13_ref[...], preferred_element_type=jnp.float32)
    h1 = h13[:, :th]
    h3 = h13[:, th:]
    # SiLU(a) = a * sigmoid(a); elementwise stays in f32 (VPU/EUP).
    gated = (h1 * jax.nn.sigmoid(h1)) * h3
    acc_ref[...] += jnp.dot(gated.astype(w2_ref.dtype), w2_ref[...],
                            preferred_element_type=jnp.float32)


def _swiff_kernel_f32_out(x_ref, w13_ref, w2_ref, o_ref):
    """f32 output: the output block doubles as the accumulator (no scratch)."""
    @pl.when(pl.program_id(1) == 0)
    def _():
        o_ref[...] = jnp.zeros_like(o_ref)

    _swiff_step(x_ref, w13_ref, w2_ref, o_ref)


def _swiff_kernel_cast_out(x_ref, w13_ref, w2_ref, o_ref, acc_ref):
    """Narrow output dtype: accumulate in f32 scratch, cast on the last step."""
    h = pl.program_id(1)

    @pl.when(h == 0)
    def _():
        acc_ref[...] = jnp.zeros_like(acc_ref)

    _swiff_step(x_ref, w13_ref, w2_ref, acc_ref)

    @pl.when(h == pl.num_programs(1) - 1)
    def _():
        o_ref[...] = acc_ref[...].astype(o_ref.dtype)


# ---------------------------------------------------------------------------
# Weight preparation (one-time, outside the per-call jit)
# ---------------------------------------------------------------------------

def fuse_ffn_weights(w1, w3, w2, *, dtype=jnp.bfloat16, th=None):
    """Fuse W1|W3 into one block-interleaved slab and pick the hidden tile th.

    Returns:
      w13: [G, D, 2*th]  per hidden-tile [W1_blk | W3_blk], cast to `dtype`.
      w2p: [G*th, D]     W2 padded along the hidden dim, cast to `dtype`.
    Zero-padding H is exact: silu(0) * 0 = 0 contributes nothing.
    """
    D, H = w1.shape
    assert w3.shape == (D, H) and w2.shape == (H, D)
    wbytes = np.dtype(dtype).itemsize
    cap = _vmem_capacity_bytes()
    scoped = _scoped_vmem_bytes(cap)

    if th is None:
        if 3 * D * H * wbytes <= scoped // 2:
            # Resident fast path: all weights fit VMEM -> G == 1, weights are
            # DMA'd once and reused across every token tile.
            th = H
        elif cap >= (96 << 20):
            th = 1024          # v5e / v6e (128 MiB VMEM): big hidden tiles
        else:
            th = 256           # v7x (64 MiB per TC): keep footprint modest
    th = min(th, H)
    if th < H:
        # Alignment: 256-multiples (v6e/v7x MXU tile) when possible, else 128
        # (lane), else 8 (sublane).  Full-H tiles need no alignment.
        for m in (256, 128, 8):
            if th >= m:
                th = (th // m) * m
                break
        else:
            th = H

    H_pad = _round_up(H, th)
    G = H_pad // th
    pad = H_pad - H
    if pad:
        w1 = jnp.pad(w1, ((0, 0), (0, pad)))
        w3 = jnp.pad(w3, ((0, 0), (0, pad)))
        w2 = jnp.pad(w2, ((0, pad), (0, 0)))
    w13 = jnp.concatenate(
        [w1.reshape(D, G, th).transpose(1, 0, 2),
         w3.reshape(D, G, th).transpose(1, 0, 2)], axis=-1)      # [G, D, 2*th]
    return w13.astype(dtype), w2.astype(dtype)


# ---------------------------------------------------------------------------
# Wrapper
# ---------------------------------------------------------------------------

@functools.partial(jax.jit, static_argnames=("tm",))
def swi_feed_forward(x, w13, w2, *, tm=None):
    """x: [B, S, D]; w13: [G, D, 2*th]; w2: [G*th, D]  ->  [B, S, D] (x.dtype)."""
    B, S, D = x.shape
    G, D2, th2 = w13.shape
    th = th2 // 2
    assert D2 == D and w2.shape == (G * th, D)

    T = B * S
    compute_dtype = w13.dtype
    out_dtype = x.dtype
    x2 = x.reshape(T, D).astype(compute_dtype)

    cap = _vmem_capacity_bytes()
    scoped = _scoped_vmem_bytes(cap)
    wb = np.dtype(compute_dtype).itemsize
    ob = np.dtype(out_dtype).itemsize
    use_out_acc = out_dtype == jnp.float32   # output block is the accumulator

    # Token tile: large enough to make the kernel MXU-bound against the weight
    # stream (arithmetic intensity ~ tm flop/byte in bf16), shrunk until the
    # estimated VMEM working set fits under the scoped limit.
    if tm is None:
        tm = 1024 if cap >= (96 << 20) else 512

    def footprint(tm_):
        f = 2 * tm_ * D * wb                   # x tile, double-buffered
        f += 2 * tm_ * D * ob                  # out tile, double-buffered
        if not use_out_acc:
            f += tm_ * D * 4                   # f32 accumulator scratch
        f += 2 * D * (2 * th) * wb             # w13 block x2
        f += 2 * th * D * wb                   # w2 block x2
        return f

    while tm > 256 and footprint(tm) > scoped:
        tm //= 2

    tm_eff = min(tm, _round_up(T, 8))
    grid = (pl.cdiv(T, tm_eff), G)

    if G > 1:
        # Serpentine the hidden axis: ascending on even token tiles, descending
        # on odd ones, so the block at the tile boundary is reused (no re-DMA).
        def hsel(i, h):
            return h + (i % 2) * (G - 1 - 2 * h)
        w13_map = lambda i, h: (hsel(i, h), 0, 0)
        w2_map = lambda i, h: (hsel(i, h), 0)
    else:
        # Resident weights: constant block index -> DMA'd once, kept in VMEM.
        w13_map = lambda i, h: (0, 0, 0)
        w2_map = lambda i, h: (0, 0)

    in_specs = [
        pl.BlockSpec((tm_eff, D), lambda i, h: (i, 0)),              # x tile
        pl.BlockSpec((pl.Squeezed(), D, 2 * th), w13_map),           # W1|W3 blk
        pl.BlockSpec((th, D), w2_map),                               # W2 block
    ]
    out_spec = pl.BlockSpec((tm_eff, D), lambda i, h: (i, 0))

    if use_out_acc:
        kernel = _swiff_kernel_f32_out
        scratch = ()
    else:
        kernel = _swiff_kernel_cast_out
        scratch = [pltpu.VMEM((tm_eff, D), jnp.float32)]

    out = pl.pallas_call(
        kernel,
        out_shape=jax.ShapeDtypeStruct((T, D), out_dtype),
        grid_spec=pltpu.PrefetchScalarGridSpec(
            num_scalar_prefetch=0,
            grid=grid,
            in_specs=in_specs,
            out_specs=out_spec,
            scratch_shapes=scratch,
        ),
        compiler_params=pltpu.CompilerParams(
            dimension_semantics=("parallel", "arbitrary"),
            vmem_limit_bytes=scoped,
        ),
    )(x2, w13, w2)

    return out.reshape(B, S, D)


# ---------------------------------------------------------------------------
# Parameter construction + references
# ---------------------------------------------------------------------------

def make_params(key, dim, hidden_dim, multiple_of, dtype=jnp.float32):
    """Replicates the __init__ hidden-dim rounding; deterministic init."""
    hidden_dim = int(2 * hidden_dim / 3)
    hidden_dim = multiple_of * ((hidden_dim + multiple_of - 1) // multiple_of)
    k1, k2, k3 = jax.random.split(key, 3)
    # nn.Linear default init: U(-1/sqrt(fan_in), 1/sqrt(fan_in)); stored
    # pre-transposed as [in, out] so the kernel computes x @ W.
    b1 = 1.0 / (dim ** 0.5)
    b2 = 1.0 / (hidden_dim ** 0.5)
    w1 = jax.random.uniform(k1, (dim, hidden_dim), dtype, -b1, b1)
    w3 = jax.random.uniform(k3, (dim, hidden_dim), dtype, -b1, b1)
    w2 = jax.random.uniform(k2, (hidden_dim, dim), dtype, -b2, b2)
    return w1, w3, w2, hidden_dim


def _reference(x, w1, w3, w2):
    """Pure f32 reference of the PyTorch forward."""
    hp = jax.lax.Precision.HIGHEST
    h1 = jnp.matmul(x, w1, precision=hp)
    h3 = jnp.matmul(x, w3, precision=hp)
    return jnp.matmul((h1 * jax.nn.sigmoid(h1)) * h3, w2, precision=hp)


def _emulated_reference(x, w1, w3, w2, dtype):
    """Reference that mimics the kernel's low-precision-in / f32-accumulate."""
    hp = jax.lax.Precision.HIGHEST
    q = lambda a: a.astype(dtype).astype(jnp.float32)
    xq, w1q, w3q, w2q = q(x), q(w1), q(w3), q(w2)
    h1 = jnp.matmul(xq, w1q, precision=hp)
    h3 = jnp.matmul(xq, w3q, precision=hp)
    gated = q((h1 * jax.nn.sigmoid(h1)) * h3)
    return jnp.matmul(gated, w2q, precision=hp)


if __name__ == "__main__":
    dim, hidden_dim_arg, multiple_of = 32, 64, 32
    batch, seq = 2, 8

    key = jax.random.PRNGKey(0)
    kx, kp = jax.random.split(key)
    w1, w3, w2, hidden_dim = make_params(kp, dim, hidden_dim_arg, multiple_of)
    x = jax.random.normal(kx, (batch, seq, dim), jnp.float32)

    # --- Test 1: default bf16 weights, resident-weight (G == 1) fast path,
    #             f32 output accumulated directly into the output block.
    w13, w2p = fuse_ffn_weights(w1, w3, w2, dtype=jnp.bfloat16)
    out = jax.block_until_ready(swi_feed_forward(x, w13, w2p))
    assert out.shape == (batch, seq, dim) and out.dtype == x.dtype

    ref_q = _emulated_reference(x, w1, w3, w2, jnp.bfloat16)
    ref_f32 = _reference(x, w1, w3, w2)
    err_q = float(jnp.max(jnp.abs(out - ref_q)))
    err_f = float(jnp.max(jnp.abs(out - ref_f32)))
    assert jnp.allclose(out, ref_q, atol=1e-2, rtol=1e-2), err_q
    assert jnp.allclose(out, ref_f32, atol=1e-1, rtol=1e-1), err_f

    # --- Test 2: forced th < H (G = 2) to exercise the streaming / serpentine
    #             path and the bf16-output (scratch accumulator + cast) kernel.
    w13s, w2s = fuse_ffn_weights(w1, w3, w2, dtype=jnp.bfloat16, th=32)
    out2 = jax.block_until_ready(swi_feed_forward(x.astype(jnp.bfloat16), w13s, w2s))
    assert out2.shape == (batch, seq, dim) and out2.dtype == jnp.bfloat16
    err2 = float(jnp.max(jnp.abs(out2.astype(jnp.float32) - ref_q)))
    assert jnp.allclose(out2.astype(jnp.float32), ref_q, atol=3e-2, rtol=3e-2), err2

    print("KERNEL_OK")
</pallas_src>

<mosaic_0001>
module attributes {stable_mosaic.version = 11 : i64} {
  func.func @_swiff_kernel_f32_out(%arg0: i32, %arg1: i32, %arg2: memref<16x32xbf16, #tpu.memory_space<vmem>>, %arg3: memref<1x32x128xbf16, #tpu.memory_space<vmem>>, %arg4: memref<64x32xbf16, #tpu.memory_space<vmem>>, %arg5: memref<16x32xf32, #tpu.memory_space<vmem>>) attributes {dimension_semantics = [#tpu.dimension_semantics<parallel>, #tpu.dimension_semantics<arbitrary>], iteration_bounds = array<i64: 1, 1>, scalar_prefetch = 0 : i64, scratch_operands = 0 : i64, tpu.core_type = #tpu.core_type<tc>, window_params = [{transform_indices = @transform_0, window_bounds = array<i64: 16, 32>}, {pipeline_mode = #tpu.pipeline_mode<synchronous>, transform_indices = @transform_1, window_bounds = array<i64: 1, 32, 128>}, {pipeline_mode = #tpu.pipeline_mode<synchronous>, transform_indices = @transform_2, window_bounds = array<i64: 64, 32>}, {transform_indices = @transform_3, window_bounds = array<i64: 16, 32>}]} {
    %c0_i32 = arith.constant 0 : i32
    %0 = arith.cmpi eq, %arg1, %c0_i32 : i32
    %1 = arith.extui %0 : i1 to i32
    %c0_i32_0 = arith.constant 0 : i32
    %2 = arith.cmpi ne, %1, %c0_i32_0 : i32
    scf.if %2 {
      %cst_13 = arith.constant 0.000000e+00 : f32
      %22 = vector.broadcast %cst_13 : f32 to vector<16x32xf32>
      %c0_14 = arith.constant 0 : index
      %c0_15 = arith.constant 0 : index
      %23 = vector.load %arg5[%c0_14, %c0_15] : memref<16x32xf32, #tpu.memory_space<vmem>>, vector<16x32xf32>
      tpu.vector_store %arg5[%c0_14, %c0_15], %22 {strides = array<i32>} : memref<16x32xf32, #tpu.memory_space<vmem>>, vector<16x32xf32>,
    } else {
    }
    %c0 = arith.constant 0 : index
    %c0_1 = arith.constant 0 : index
    %3 = vector.load %arg2[%c0, %c0_1] : memref<16x32xbf16, #tpu.memory_space<vmem>>, vector<16x32xbf16>
    %c0_2 = arith.constant 0 : index
    %c0_3 = arith.constant 0 : index
    %c0_4 = arith.constant 0 : index
    %4 = vector.load %arg3[%c0_2, %c0_3, %c0_4] : memref<1x32x128xbf16, #tpu.memory_space<vmem>>, vector<1x32x128xbf16>
    %5 = vector.shape_cast %4 : vector<1x32x128xbf16> to vector<32x128xbf16>
    %cst = arith.constant dense<0.000000e+00> : vector<16x128xf32>
    %6 = tpu.matmul %3, %5, %cst {dimension_numbers = #tpu.dot_dimension_numbers<[1], [0], [0], [1], [0, 0, 1, 1], [], []>} : vector<16x32xbf16>, vector<32x128xbf16>, vector<16x128xf32> -> vector<16x128xf32>
    %7 = vector.extract_strided_slice %6 {offsets = [0, 0], sizes = [16, 64], strides = [1, 1]} : vector<16x128xf32> to vector<16x64xf32>
    %8 = vector.extract_strided_slice %6 {offsets = [0, 64], sizes = [16, 64], strides = [1, 1]} : vector<16x128xf32> to vector<16x64xf32>
    %9 = arith.negf %7 : vector<16x64xf32>
    %10 = math.exp %9 : vector<16x64xf32>
    %cst_5 = arith.constant 1.000000e+00 : f32
    %11 = vector.broadcast %cst_5 : f32 to vector<16x64xf32>
    %12 = arith.addf %11, %10 : vector<16x64xf32>
    %13 = arith.divf %11, %12 : vector<16x64xf32>
    %14 = arith.mulf %7, %13 : vector<16x64xf32>
    %15 = arith.mulf %14, %8 : vector<16x64xf32>
    %c0_6 = arith.constant 0 : index
    %c0_7 = arith.constant 0 : index
    %16 = vector.load %arg5[%c0_6, %c0_7] : memref<16x32xf32, #tpu.memory_space<vmem>>, vector<16x32xf32>
    %17 = arith.truncf %15 : vector<16x64xf32> to vector<16x64xbf16>
    %c0_8 = arith.constant 0 : index
    %c0_9 = arith.constant 0 : index
    %18 = vector.load %arg4[%c0_8, %c0_9] : memref<64x32xbf16, #tpu.memory_space<vmem>>, vector<64x32xbf16>
    %cst_10 = arith.constant dense<0.000000e+00> : vector<16x32xf32>
    %19 = tpu.matmul %17, %18, %cst_10 {dimension_numbers = #tpu.dot_dimension_numbers<[1], [0], [0], [1], [0, 0, 1, 1], [], []>} : vector<16x64xbf16>, vector<64x32xbf16>, vector<16x32xf32> -> vector<16x32xf32>
    %20 = arith.addf %16, %19 : vector<16x32xf32>
    %c0_11 = arith.constant 0 : index
    %c0_12 = arith.constant 0 : index
    %21 = vector.load %arg5[%c0_11, %c0_12] : memref<16x32xf32, #tpu.memory_space<vmem>>, vector<16x32xf32>
    tpu.vector_store %arg5[%c0_11, %c0_12], %20 {strides = array<i32>} : memref<16x32xf32, #tpu.memory_space<vmem>>, vector<16x32xf32>,
    return
  }
  func.func @transform_0(%arg0: i32, %arg1: i32) -> (i32, i32) {
    %c0_i32 = arith.constant 0 : i32
    %c0_i32_0 = arith.constant 0 : i32
    return %arg0, %c0_i32 : i32, i32
  }
  func.func @transform_1(%arg0: i32, %arg1: i32) -> (i32, i32, i32) {
    %c0_i32 = arith.constant 0 : i32
    %c0_i32_0 = arith.constant 0 : i32
    %c0_i32_1 = arith.constant 0 : i32
    %c0_i32_2 = arith.constant 0 : i32
    return %c0_i32, %c0_i32_0, %c0_i32_1 : i32, i32, i32
  }
  func.func @transform_2(%arg0: i32, %arg1: i32) -> (i32, i32) {
    %c0_i32 = arith.constant 0 : i32
    %c0_i32_0 = arith.constant 0 : i32
    %c0_i32_1 = arith.constant 0 : i32
    return %c0_i32, %c0_i32_0 : i32, i32
  }
  func.func @transform_3(%arg0: i32, %arg1: i32) -> (i32, i32) {
    %c0_i32 = arith.constant 0 : i32
    %c0_i32_0 = arith.constant 0 : i32
    return %arg0, %c0_i32 : i32, i32
  }
}

</mosaic_0001>

<bundles_post_ra>
// kernel: swi_feed_forward.1
= control target key start
LH: loop header
LB: loop body
LE: loop exit
PB: predicated region body
PF: predicated region fallthrough
CT: control target
= control target key end

     0   :  { %s321_s0 = inlined_call_operand.vmem [shape: bf16[16,32], index: 0, kind: input, shape index: {}]   ;;  %s322_s1 = inlined_call_operand.vmem [shape: bf16[1,32,128], index: 1, kind: input, shape index: {}]   ;;  %s323_s2 = inlined_call_operand.vmem [shape: bf16[64,32], index: 2, kind: input, shape index: {}]   ;;  %s324_s3 = inlined_call_operand.hbm [shape: f32[16,32], index: 3, kind: output, shape index: {}]  }
   0x1   :  { %v223_v0 = vld [vmem:[%s322_s1 + $0x8] sm:$0xff] }
   0x2   :  { %8 = vsyncpa [#allocation3], 0  ;;  %56 = vmatpush.bf16.msra.mxu0 %v223_v0  ;;  %v222_v1 = vld [vmem:[%s322_s1] sm:$0xff]  ;;  %vm20_vm0 = vcmask 261120   ;;  %s267_s18 = smov 64   ;;  %v227_v4 = vld [vmem:[%s323_s2 + $0x18] sm:$0xff] }
   0x3   :  { %v221_v2 = vld [vmem:[%s321_s0] sm:$0xff]  ;;  %157 = vmatpush.bf16.msra.mxu1 %v227_v4  ;;  %v226_v9 = vld [vmem:[%s323_s2 + $0x10] sm:$0xff]  ;;  %v225_v11 = vld [vmem:[%s323_s2 + $0x8] sm:$0xff]  ;;  %v268_v17 = vmov 0.0   ;;  %vm149_vm9 = vcmask 523264   ;;  %s177_s28 = sshll.u32 %s324_s3, 4  ;;  %s178_s28 = int_to_ptr.hbm [resolvable:$true] %s177_s28 }
   0x4   :  { %v224_v14 = vld [vmem:[%s323_s2] sm:$0xff]  ;;  %21 = vst.msk [vmem:[#allocation2] sm:$0xff] %vm20_vm0, %v268_v17  ;;  %s269_s2 = smov [#allocation2]   ;;  %s270_s29 = smov 128  }
   0x5   :  { %22 = vst.msk [vmem:[#allocation2 + $0x8] sm:$0xff] %vm20_vm0, %v268_v17  ;;  %s175_s25 = sshll.u32 %s269_s2, 4  ;;  %s271_s30 = smov 8   ;;  %s176_s25 = int_to_ptr.vmem [resolvable:$true] %s175_s25 }
   0x6   :  { %57 = vmatpush.bf16.msra.mxu0 %v222_v1 }
   0x7   :  { %158 = vmatpush.bf16.msra.mxu1 %v226_v9 }
   0x9   :  { %201 = vmatmul.msk.bf16.vlgmr.msra.gmra.mxu0 %vm20_vm0, %v221_v2 }
   0xb   :  { %159 = vmatpush.bf16.msra.mxu1 %v225_v11  ;;  %v114_v43 = vld [vmem:[#allocation2] sm:$0xff] }
   0xc   :  { %v115_v46 = vld [vmem:[#allocation2 + $0x8] sm:$0xff] }
   0xf   :  { %160 = vmatpush.bf16.msra.mxu1 %v224_v14 }
  0x86   :  { %v59_v3 = vpop.f32.mrf.mxu0 }
  0x87   :  { %106 = vrot.lane.b32.xlu0 %v59_v3, %s267_s18  ;;  %v202_v6 = vmul.f32 -1.442695, %v59_v3 }
  0x89   :  { %233 = vpow2.f32 %v202_v6 }
  0x8e   :  { %v61_v5 = vpop.f32.mrf.mxu0 }
  0x8f   :  { %108 = vrot.lane.b32.xlu0 %v61_v5, %s267_s18  ;;  %v203_v7 = vmul.f32 -1.442695, %v61_v5  ;;  %v234_v8 = vpop.eup %233 }
  0x90   :  { %v70_v12 = vadd.f32 1.0, %v234_v8 }
  0x91   :  { %235 = vpow2.f32 %v203_v7 }
  0x92   :  { %237 = vrcp.f32 %v70_v12  ;;  %vm77_vm3 = vweird.f32 %v70_v12  ;;  %v83_v27 = vand.u32 2147483648, %v70_v12  ;;  %v81_v29 = vand.u32 2147483647, %v70_v12 }
  0x94   :  { %v84_v34 = vor.u32 1.1754944e-38, %v83_v27  ;;  %vm82_vm8 = vcmp.eq.f32.partialorder %v81_v29, 8.507059e+37 }
  0x97   :  { %v236_v10 = vpop.eup %235 }
  0x98   :  { %v71_v13 = vadd.f32 1.0, %v236_v10  ;;  %v238_v15 = vpop.eup %237 }
  0x99   :  { %v73_v19 = vmul.f32 %v238_v15, %v70_v12  ;;  %vm78_vm1 = vweird.f32 %v238_v15 }
  0x9a   :  { %239 = vrcp.f32 %v71_v13  ;;  %v98_v26 = vand.u32 2147483648, %v71_v13  ;;  %vm92_vm4 = vweird.f32 %v71_v13  ;;  %v96_v28 = vand.u32 2147483647, %v71_v13  ;;  %vm79_vm5 = vmor %vm77_vm3, %vm78_vm1 }
  0x9b   :  { %v74_v21 = vsub.f32 1.0, %v73_v19 }
  0x9c   :  { %v99_v33 = vor.u32 1.1754944e-38, %v98_v26  ;;  %vm97_vm7 = vcmp.eq.f32.partialorder %v96_v28, 8.507059e+37 }
  0x9d   :  { %v75_v23 = vmul.f32 %v238_v15, %v74_v21 }
  0x9f   :  { %v76_v25 = vadd.f32 %v238_v15, %v75_v23 }
  0xa0   :  { %v240_v16 = vpop.eup %239 }
  0xa1   :  { %v88_v18 = vmul.f32 %v240_v16, %v71_v13  ;;  %vm93_vm2 = vweird.f32 %v240_v16  ;;  %v80_v32 = vsel %vm79_vm5, %v238_v15, %v76_v25 }
  0xa2   :  { %vm94_vm6 = vmor %vm92_vm4, %vm93_vm2  ;;  %v85_v36 = vsel %vm82_vm8, %v84_v34, %v80_v32 }
  0xa3   :  { %v89_v20 = vsub.f32 1.0, %v88_v18  ;;  %v102_v38 = vmul.f32 %v85_v36, %v59_v3 }
  0xa5   :  { %v90_v22 = vmul.f32 %v240_v16, %v89_v20 }
  0xa7   :  { %v91_v24 = vadd.f32 %v240_v16, %v90_v22 }
  0xa9   :  { %v95_v31 = vsel %vm94_vm6, %v240_v16, %v91_v24 }
  0xaa   :  { %v100_v35 = vsel %vm97_vm7, %v99_v33, %v95_v31 }
  0xab   :  { %v103_v37 = vmul.f32 %v100_v35, %v61_v5 }
  0xf9   :  { %v107_v30 = vpop.permute.xlu0 %106 }
  0xfa   :  { %v112_v40 = vmul.f32 %v107_v30, %v102_v38 }
 0x101   :  { %v109_v39 = vpop.permute.xlu0 %108 }
 0x102   :  { %v113_v41 = vmul.f32 %v109_v39, %v103_v37 }
 0x104   :  { %v116_v42 = vpack.c.bf16 %v113_v41, %v112_v40 }
 0x106   :  { %220 = vmatmul.msk.bf16.vlgmr.msra.gmra.mxu1 %vm149_vm9, %v116_v42 }
 0x183   :  { %v162_v44 = vpop.f32.mrf.mxu1 }
 0x184   :  { %v167_v45 = vadd.f32 %v162_v44, %v114_v43 }
 0x186   :  { %169 = vst.msk [vmem:[#allocation2] sm:$0xff] %vm20_vm0, %v167_v45 }
 0x18b   :  { %v164_v47 = vpop.f32.mrf.mxu1 }
 0x18c   :  { %v168_v48 = vadd.f32 %v164_v47, %v115_v46 }
 0x18e   :  { %170 = vst.msk [vmem:[#allocation2 + $0x8] sm:$0xff] %vm20_vm0, %v168_v48 }
 0x18f   :  { %183 = dma.vmem_to_hbm [thread:$0]  %s176_s25, 256, %s178_s28, [#allocation3], %s270_s29, %s270_s29, %s271_s30  }
 0x190   :  { %265 = dma.done.wait [#allocation3], 256  }
 0x191   :  { %266 = vsyncadd [#allocation3], 4294967040 }
 0x192   :  { %188 = vsyncpa [#allocation3], 1 }

</bundles_post_ra>
